<compile_context>
chip_gen: v7x
topology: tpu7x:2x2x1
jax: 0.10.0
libtpu: 0.0.40
codegen_flags: <defaults>
</compile_context>

<pallas_src>
import math

import jax
import jax.numpy as jnp
from jax.experimental import pallas as pl
from jax.experimental.pallas import tpu as pltpu

DIM = 32  # self.dim in NKRRSolver


def _round_up(x, m):
    return ((x + m - 1) // m) * m


# ---------------------------------------------------------------------------
# Pallas kernel: Gaussian kernel mat-vec, tiled over queries (i) and centers (j).
# ---------------------------------------------------------------------------
def _nkrr_predict_kernel(x_ref, inv_ref, ct_ref, cc_ref, a_ref, o_ref,
                         xs_ref, xx_ref, acc_ref):
    j = pl.program_id(1)

    # Per-query-tile invariants: scale X once (multiply, not divide) and
    # compute ||x_s||^2 once; reuse across the whole center reduction.
    @pl.when(j == 0)
    def _():
        xs = x_ref[...] * inv_ref[...]                       # (tn, D)
        xs_ref[...] = xs
        xx_ref[...] = jnp.sum(xs * xs, axis=-1, keepdims=True)  # (tn, 1)
        acc_ref[...] = jnp.zeros_like(acc_ref)

    xs = xs_ref[...]                                         # (tn, D)
    # MXU: xs @ c_s^T, centers already scaled & transposed in the wrapper.
    xc = jnp.dot(xs, ct_ref[...], preferred_element_type=jnp.float32)  # (tn, tm)

    # With s = 1/(sigma*sqrt(2)):  -0.5*||x/sig - c/sig||^2 = 2*xs.cs - xx - cc
    kvals = jnp.exp(2.0 * xc - xx_ref[...] - cc_ref[...])    # (tn, tm)  EUP

    # Weighted reduction over this center tile: VPU mul + XLU lane-reduce.
    acc_ref[...] += jnp.sum(kvals * a_ref[...], axis=-1, keepdims=True)

    @pl.when(j == pl.num_programs(1) - 1)
    def _():
        o_ref[...] = acc_ref[...].astype(o_ref.dtype)


def nkrr_predict(X, centers, alphas, sigma, *, tn=512, tm=512):
    """out[i] = sum_j exp(-0.5*||(x_i - c_j)/sigma||^2) * alpha_j  (Pallas)."""
    N, D = X.shape
    M, _ = centers.shape
    dtype = X.dtype

    # sigma may be a scalar or a per-dim vector; fold sqrt(2) so the -0.5
    # in the exponent disappears.
    sigma_vec = jnp.broadcast_to(
        jnp.asarray(sigma, jnp.float32).reshape(-1), (D,))
    inv_s = (1.0 / (sigma_vec * math.sqrt(2.0))).reshape(1, D).astype(dtype)

    # Clamp tiles to the (padded) problem size; keep lane/sublane legality.
    tn = min(tn, _round_up(N, 8))          # multiple of 8 (sublanes)
    tm = min(tm, _round_up(M, 128))        # multiple of 128 (lanes)
    Np = _round_up(N, tn)
    Mp = _round_up(M, tm)

    # Hoisted, loop-invariant center work (done once, not per grid step).
    cs = centers.astype(jnp.float32) * inv_s.astype(jnp.float32)   # (M, D)
    ct = jnp.zeros((D, Mp), dtype).at[:, :M].set(cs.T.astype(dtype))
    cc = jnp.zeros((1, Mp), dtype).at[:, :M].set(
        jnp.sum(cs * cs, axis=-1)[None, :].astype(dtype))
    a_row = jnp.zeros((1, Mp), dtype).at[:, :M].set(
        alphas.reshape(1, -1).astype(dtype))                       # padded alphas = 0

    Xp = jnp.zeros((Np, D), dtype).at[:N].set(X)

    out = pl.pallas_call(
        _nkrr_predict_kernel,
        out_shape=jax.ShapeDtypeStruct((Np, 1), dtype),
        grid_spec=pltpu.PrefetchScalarGridSpec(
            num_scalar_prefetch=0,
            grid=(Np // tn, Mp // tm),                 # reduction axis (M) last
            in_specs=[
                pl.BlockSpec((tn, D), lambda i, j: (i, 0)),   # X tile
                pl.BlockSpec((1, D), lambda i, j: (0, 0)),    # inv_sigma
                pl.BlockSpec((D, tm), lambda i, j: (0, j)),   # scaled centers^T
                pl.BlockSpec((1, tm), lambda i, j: (0, j)),   # ||c_s||^2 row
                pl.BlockSpec((1, tm), lambda i, j: (0, j)),   # alphas row
            ],
            out_specs=pl.BlockSpec((tn, 1), lambda i, j: (i, 0)),
            scratch_shapes=[
                pltpu.VMEM((tn, D), jnp.float32),   # scaled query tile
                pltpu.VMEM((tn, 1), jnp.float32),   # ||x_s||^2
                pltpu.VMEM((tn, 1), jnp.float32),   # accumulator
            ],
        ),
        compiler_params=pltpu.CompilerParams(
            dimension_semantics=("parallel", "arbitrary"),
            vmem_limit_bytes=32 * 1024 * 1024,      # safe on v5e/v6e/v7x
        ),
    )(Xp, inv_s, ct, cc, a_row)

    return out[:N]


# ---------------------------------------------------------------------------
# Plain-JAX glue: Gaussian kernel + Nystrom fit (mirrors NKRRSolver.fit).
# ---------------------------------------------------------------------------
def _gauss_kernel(a, b, sigma):
    a = a / sigma
    b = b / sigma
    sq = (
        jnp.sum(a * a, axis=1)[:, None]
        + jnp.sum(b * b, axis=1)[None, :]
        - 2.0 * a @ b.T
    )
    return jnp.exp(-0.5 * sq)


def nkrr_fit(X, Y, centers, sigma, penalty):
    # TODO(synk): linear solve stays in plain JAX (no Pallas equivalent needed).
    n = X.shape[0]
    variance = penalty * n
    kmn = _gauss_kernel(centers, X, sigma)            # (M, N)
    kmm = _gauss_kernel(centers, centers, sigma)      # (M, M)
    k = kmn @ kmn.T + variance * kmm
    k = k + variance * jnp.eye(k.shape[0], dtype=X.dtype)
    alphas = jnp.linalg.solve(k, kmn) @ Y             # (M, 1)
    return alphas


# Pure-JAX reference of the forward, for correctness check.
def _predict_ref(X, centers, alphas, sigma):
    k = _gauss_kernel(X, centers, jnp.asarray(sigma, X.dtype))
    return k @ alphas


if __name__ == "__main__":
    key = jax.random.PRNGKey(0)
    k1, k2, k3 = jax.random.split(key, 3)

    N_train, N_test, M = 32, 16, 64
    sigma = 2.0
    penalty = 1e-3

    X_train = jax.random.normal(k1, (N_train, DIM), dtype=jnp.float32)
    Y_train = jax.random.normal(k2, (N_train, 1), dtype=jnp.float32)
    centers = jax.random.normal(k3, (M, DIM), dtype=jnp.float32)
    X_test = jax.random.normal(jax.random.PRNGKey(1), (N_test, DIM),
                               dtype=jnp.float32)

    # Deterministic parameter init via the Nystrom solve (glue, plain JAX).
    alphas = nkrr_fit(X_train, Y_train, centers, sigma, penalty)

    # Pallas forward.
    out = nkrr_predict(X_test, centers, alphas, sigma)
    out = jax.block_until_ready(out)

    ref = _predict_ref(X_test, centers, alphas, sigma)
    assert out.shape == (N_test, 1)
    assert jnp.allclose(out, ref, rtol=1e-5, atol=1e-5), (
        f"max abs err {jnp.max(jnp.abs(out - ref))}"
    )

    print("KERNEL_OK")
</pallas_src>

<mosaic_0001>
module attributes {stable_mosaic.version = 11 : i64} {
  func.func @_nkrr_predict_kernel(%arg0: i32, %arg1: i32, %arg2: memref<16x32xf32, #tpu.memory_space<vmem>>, %arg3: memref<1x32xf32, #tpu.memory_space<vmem>>, %arg4: memref<32x128xf32, #tpu.memory_space<vmem>>, %arg5: memref<1x128xf32, #tpu.memory_space<vmem>>, %arg6: memref<1x128xf32, #tpu.memory_space<vmem>>, %arg7: memref<16x1xf32, #tpu.memory_space<vmem>>, %arg8: memref<16x32xf32, #tpu.memory_space<vmem>>, %arg9: memref<16x1xf32, #tpu.memory_space<vmem>>, %arg10: memref<16x1xf32, #tpu.memory_space<vmem>>) attributes {dimension_semantics = [#tpu.dimension_semantics<parallel>, #tpu.dimension_semantics<arbitrary>], iteration_bounds = array<i64: 1, 1>, scalar_prefetch = 0 : i64, scratch_operands = 3 : i64, tpu.core_type = #tpu.core_type<tc>, window_params = [{transform_indices = @transform_0, window_bounds = array<i64: 16, 32>}, {pipeline_mode = #tpu.pipeline_mode<synchronous>, transform_indices = @transform_1, window_bounds = array<i64: 1, 32>}, {transform_indices = @transform_2, window_bounds = array<i64: 32, 128>}, {transform_indices = @transform_3, window_bounds = array<i64: 1, 128>}, {transform_indices = @transform_4, window_bounds = array<i64: 1, 128>}, {transform_indices = @transform_5, window_bounds = array<i64: 16, 1>}]} {
    %c0_i32 = arith.constant 0 : i32
    %0 = arith.cmpi eq, %arg1, %c0_i32 : i32
    %1 = arith.extui %0 : i1 to i32
    %c0_i32_0 = arith.constant 0 : i32
    %2 = arith.cmpi ne, %1, %c0_i32_0 : i32
    scf.if %2 {
      %c0_18 = arith.constant 0 : index
      %c0_19 = arith.constant 0 : index
      %26 = vector.load %arg2[%c0_18, %c0_19] : memref<16x32xf32, #tpu.memory_space<vmem>>, vector<16x32xf32>
      %c0_20 = arith.constant 0 : index
      %c0_21 = arith.constant 0 : index
      %27 = vector.load %arg3[%c0_20, %c0_21] : memref<1x32xf32, #tpu.memory_space<vmem>>, vector<1x32xf32>
      %28 = vector.broadcast %27 : vector<1x32xf32> to vector<16x32xf32>
      %29 = arith.mulf %26, %28 : vector<16x32xf32>
      %c0_22 = arith.constant 0 : index
      %c0_23 = arith.constant 0 : index
      %30 = vector.load %arg8[%c0_22, %c0_23] : memref<16x32xf32, #tpu.memory_space<vmem>>, vector<16x32xf32>
      tpu.vector_store %arg8[%c0_22, %c0_23], %29 {strides = array<i32>} : memref<16x32xf32, #tpu.memory_space<vmem>>, vector<16x32xf32>,
      %31 = arith.mulf %29, %29 : vector<16x32xf32>
      %cst_24 = arith.constant dense<0.000000e+00> : vector<16xf32>
      %32 = vector.multi_reduction <add>, %31, %cst_24 [1] : vector<16x32xf32> to vector<16xf32>
      %33 = vector.shape_cast %32 : vector<16xf32> to vector<16x1xf32>
      %c0_25 = arith.constant 0 : index
      %c0_26 = arith.constant 0 : index
      %34 = vector.load %arg9[%c0_25, %c0_26] : memref<16x1xf32, #tpu.memory_space<vmem>>, vector<16x1xf32>
      tpu.vector_store %arg9[%c0_25, %c0_26], %33 {strides = array<i32>} : memref<16x1xf32, #tpu.memory_space<vmem>>, vector<16x1xf32>,
      %cst_27 = arith.constant 0.000000e+00 : f32
      %35 = vector.broadcast %cst_27 : f32 to vector<16x1xf32>
      %c0_28 = arith.constant 0 : index
      %c0_29 = arith.constant 0 : index
      %36 = vector.load %arg10[%c0_28, %c0_29] : memref<16x1xf32, #tpu.memory_space<vmem>>, vector<16x1xf32>
      tpu.vector_store %arg10[%c0_28, %c0_29], %35 {strides = array<i32>} : memref<16x1xf32, #tpu.memory_space<vmem>>, vector<16x1xf32>,
    } else {
    }
    %c0 = arith.constant 0 : index
    %c0_1 = arith.constant 0 : index
    %3 = vector.load %arg8[%c0, %c0_1] : memref<16x32xf32, #tpu.memory_space<vmem>>, vector<16x32xf32>
    %c0_2 = arith.constant 0 : index
    %c0_3 = arith.constant 0 : index
    %4 = vector.load %arg4[%c0_2, %c0_3] : memref<32x128xf32, #tpu.memory_space<vmem>>, vector<32x128xf32>
    %cst = arith.constant dense<0.000000e+00> : vector<16x128xf32>
    %5 = tpu.matmul %3, %4, %cst {dimension_numbers = #tpu.dot_dimension_numbers<[1], [0], [0], [1], [0, 0, 1, 1], [], []>} : vector<16x32xf32>, vector<32x128xf32>, vector<16x128xf32> -> vector<16x128xf32>
    %cst_4 = arith.constant 2.000000e+00 : f32
    %6 = vector.broadcast %cst_4 : f32 to vector<16x128xf32>
    %7 = arith.mulf %6, %5 : vector<16x128xf32>
    %c0_5 = arith.constant 0 : index
    %c0_6 = arith.constant 0 : index
    %8 = vector.load %arg9[%c0_5, %c0_6] : memref<16x1xf32, #tpu.memory_space<vmem>>, vector<16x1xf32>
    %9 = vector.broadcast %8 : vector<16x1xf32> to vector<16x128xf32>
    %10 = arith.subf %7, %9 : vector<16x128xf32>
    %c0_7 = arith.constant 0 : index
    %c0_8 = arith.constant 0 : index
    %11 = vector.load %arg5[%c0_7, %c0_8] : memref<1x128xf32, #tpu.memory_space<vmem>>, vector<1x128xf32>
    %12 = vector.broadcast %11 : vector<1x128xf32> to vector<16x128xf32>
    %13 = arith.subf %10, %12 : vector<16x128xf32>
    %14 = math.exp %13 : vector<16x128xf32>
    %c0_9 = arith.constant 0 : index
    %c0_10 = arith.constant 0 : index
    %15 = vector.load %arg10[%c0_9, %c0_10] : memref<16x1xf32, #tpu.memory_space<vmem>>, vector<16x1xf32>
    %c0_11 = arith.constant 0 : index
    %c0_12 = arith.constant 0 : index
    %16 = vector.load %arg6[%c0_11, %c0_12] : memref<1x128xf32, #tpu.memory_space<vmem>>, vector<1x128xf32>
    %17 = vector.broadcast %16 : vector<1x128xf32> to vector<16x128xf32>
    %18 = arith.mulf %14, %17 : vector<16x128xf32>
    %cst_13 = arith.constant dense<0.000000e+00> : vector<16xf32>
    %19 = vector.multi_reduction <add>, %18, %cst_13 [1] : vector<16x128xf32> to vector<16xf32>
    %20 = vector.shape_cast %19 : vector<16xf32> to vector<16x1xf32>
    %21 = arith.addf %15, %20 : vector<16x1xf32>
    %c0_14 = arith.constant 0 : index
    %c0_15 = arith.constant 0 : index
    %22 = vector.load %arg10[%c0_14, %c0_15] : memref<16x1xf32, #tpu.memory_space<vmem>>, vector<16x1xf32>
    tpu.vector_store %arg10[%c0_14, %c0_15], %21 {strides = array<i32>} : memref<16x1xf32, #tpu.memory_space<vmem>>, vector<16x1xf32>,
    %c0_i32_16 = arith.constant 0 : i32
    %23 = arith.cmpi eq, %arg1, %c0_i32_16 : i32
    %24 = arith.extui %23 : i1 to i32
    %c0_i32_17 = arith.constant 0 : i32
    %25 = arith.cmpi ne, %24, %c0_i32_17 : i32
    scf.if %25 {
      %c0_18 = arith.constant 0 : index
      %c0_19 = arith.constant 0 : index
      %26 = vector.load %arg10[%c0_18, %c0_19] : memref<16x1xf32, #tpu.memory_space<vmem>>, vector<16x1xf32>
      %c0_20 = arith.constant 0 : index
      %c0_21 = arith.constant 0 : index
      %27 = vector.load %arg7[%c0_20, %c0_21] : memref<16x1xf32, #tpu.memory_space<vmem>>, vector<16x1xf32>
      tpu.vector_store %arg7[%c0_20, %c0_21], %26 {strides = array<i32>} : memref<16x1xf32, #tpu.memory_space<vmem>>, vector<16x1xf32>,
    } else {
    }
    return
  }
  func.func @transform_0(%arg0: i32, %arg1: i32) -> (i32, i32) {
    %c0_i32 = arith.constant 0 : i32
    %c0_i32_0 = arith.constant 0 : i32
    return %arg0, %c0_i32 : i32, i32
  }
  func.func @transform_1(%arg0: i32, %arg1: i32) -> (i32, i32) {
    %c0_i32 = arith.constant 0 : i32
    %c0_i32_0 = arith.constant 0 : i32
    %c0_i32_1 = arith.constant 0 : i32
    return %c0_i32, %c0_i32_0 : i32, i32
  }
  func.func @transform_2(%arg0: i32, %arg1: i32) -> (i32, i32) {
    %c0_i32 = arith.constant 0 : i32
    %c0_i32_0 = arith.constant 0 : i32
    return %c0_i32, %arg1 : i32, i32
  }
  func.func @transform_3(%arg0: i32, %arg1: i32) -> (i32, i32) {
    %c0_i32 = arith.constant 0 : i32
    %c0_i32_0 = arith.constant 0 : i32
    return %c0_i32, %arg1 : i32, i32
  }
  func.func @transform_4(%arg0: i32, %arg1: i32) -> (i32, i32) {
    %c0_i32 = arith.constant 0 : i32
    %c0_i32_0 = arith.constant 0 : i32
    return %c0_i32, %arg1 : i32, i32
  }
  func.func @transform_5(%arg0: i32, %arg1: i32) -> (i32, i32) {
    %c0_i32 = arith.constant 0 : i32
    %c0_i32_0 = arith.constant 0 : i32
    return %arg0, %c0_i32 : i32, i32
  }
}

</mosaic_0001>

<bundles_post_ra>
// kernel: tpu_custom_call.1
= control target key start
LH: loop header
LB: loop body
LE: loop exit
PB: predicated region body
PF: predicated region fallthrough
CT: control target
= control target key end

     0   :  { %10 = vsyncpa [#allocation6], 0  ;;  %s408_s0 = inlined_call_operand.hbm [shape: f32[16,32], index: 0, kind: input, shape index: {}]   ;;  %s409_s1 = inlined_call_operand.vmem [shape: f32[1,32], index: 1, kind: input, shape index: {}]   ;;  %s410_s2 = inlined_call_operand.hbm [shape: f32[32,128], index: 2, kind: input, shape index: {}]   ;;  %s411_s3 = inlined_call_operand.vmem [shape: f32[1,128], index: 3, kind: input, shape index: {}]   ;;  %s412_s4 = inlined_call_operand.vmem [shape: f32[1,128], index: 4, kind: input, shape index: {}]   ;;  %s413_s5 = inlined_call_operand.vmem [shape: f32[16,1], index: 5, kind: output, shape index: {}]  }
   0x1   :  { %11 = vsyncpa [#allocation8], 0  ;;  %s319_s18 = smov [#allocation5]   ;;  %s271_s22 = scalar_lea.hbm %s408_s0, 256 }
   0x2   :  { %s17_s19 = sshll.u32 %s319_s18, 4  ;;  %p272_p0 = scmp.ne.s32.totalorder %s408_s0, %s271_s22  ;;  %s18_s19 = int_to_ptr.vmem [resolvable:$true] %s17_s19 }
   0x3   :  { %p275_p1 = scmp.lt.u32.totalorder %s271_s22, %s408_s0 }
   0x5   :  { %p277_p2 = pnand %p275_p1, %p272_p0 }
   0x7   :  { %280 = shalt.err (!%p277_p2)
}
   0x8   :  { %s281_s27 = scalar_lea.vmem %s18_s19, 256  ;;  %p286_p4 = scmp.lt.s32.totalorder %s18_s19, %s18_s19 }
   0x9   :  { %p282_p3 = scmp.ne.s32.totalorder %s18_s19, %s281_s27  ;;  %p287_p5 = scmp.lt.s32.totalorder %s281_s27, %s281_s27 }
   0xb   :  { %p288_p6 = por %p287_p5, %p286_p4 }
   0xd   :  { %p289_p7 = pnand %p288_p6, %p282_p3 }
   0xf   :  { %292 = shalt.err (!%p289_p7)
}
  0x10   :  { %s320_s28 = smov 128   ;;  %s321_s29 = smov 8  }
  0x11   :  { %23 = dma.hbm_to_vmem [thread:$0]  %s408_s0, 256, %s18_s19, [#allocation6], %s320_s28, %s320_s28, %s321_s29  }
  0x12   :  { %s322_s7 = smov [#allocation7]   ;;  %s293_s11 = scalar_lea.hbm %s410_s2, 512 }
  0x13   :  { %s31_s8 = sshll.u32 %s322_s7, 4  ;;  %p294_p8 = scmp.ne.s32.totalorder %s410_s2, %s293_s11  ;;  %s32_s8 = int_to_ptr.vmem [resolvable:$true] %s31_s8 }
  0x14   :  { %p297_p9 = scmp.lt.u32.totalorder %s293_s11, %s410_s2 }
  0x16   :  { %p299_p10 = pnand %p297_p9, %p294_p8 }
  0x18   :  { %302 = shalt.err (!%p299_p10)
}
  0x19   :  { %s303_s16 = scalar_lea.vmem %s32_s8, 512  ;;  %p308_p12 = scmp.lt.s32.totalorder %s32_s8, %s32_s8 }
  0x1a   :  { %p304_p11 = scmp.ne.s32.totalorder %s32_s8, %s303_s16  ;;  %p309_p13 = scmp.lt.s32.totalorder %s303_s16, %s303_s16 }
  0x1c   :  { %p310_p0 = por %p309_p13, %p308_p12 }
  0x1e   :  { %p311_p1 = pnand %p310_p0, %p304_p11 }
  0x20   :  { %314 = shalt.err (!%p311_p1)
}
  0x21   :  { %37 = dma.hbm_to_vmem [thread:$0]  %s410_s2, 512, %s32_s8, [#allocation8], %s320_s28, %s320_s28, %s321_s29  }
  0x22   :  { %315 = dma.done.wait [#allocation6], 256  }
  0x23   :  { %316 = vsyncadd [#allocation6], 4294967040 }
  0x24   :  { %317 = dma.done.wait [#allocation8], 512  }
  0x25   :  { %318 = vsyncadd [#allocation8], 4294966784  ;;  %v52_v0 = vld [vmem:[#allocation5] sm:$0xff]  ;;  %v229_v1 = vld [vmem:[%s409_s1] ss:$0 sm:$0xff]  ;;  %vm63_vm0 = vcmask 261120  }
  0x26   :  { %v53_v2 = vld [vmem:[#allocation5 + $0x8] sm:$0xff]  ;;  %v61_v3 = vmul.f32 %v229_v1, %v52_v0  ;;  %v81_v5 = vld [vmem:[#allocation7] sm:$0xff]  ;;  %v82_v6 = vld [vmem:[#allocation7 + $0x8] sm:$0xff]  ;;  %v323_v17 = vmov 0   ;;  %vm74_vm1 = vcmask 7168   ;;  %v324_v22 = vmov 0.0  }
  0x27   :  { %v62_v4 = vmul.f32 %v229_v1, %v53_v2  ;;  %v83_v7 = vld [vmem:[#allocation7 + $0x10] sm:$0xff]  ;;  %v251_v8 = vpack.c.bf16 %v82_v6, %v81_v5  ;;  %v84_v9 = vld [vmem:[#allocation7 + $0x18] sm:$0xff]  ;;  %265 = vset.pattern.permute.xlu1 %v323_v17  ;;  %266 = vset.pattern.permute.xlu0 %v323_v17  ;;  %77 = vst.msk [vmem:[#allocation4] sm:$0xff] %vm74_vm1, %v324_v22  ;;  %78 = vst.msk [vmem:[#allocation4 + $0x8] sm:$0xff] %vm74_vm1, %v324_v22 }
  0x28   :  { %v66_v10 = vmul.f32 %v61_v3, %v61_v3  ;;  %64 = vst.msk [vmem:[#allocation2] sm:$0xff] %vm63_vm0, %v61_v3  ;;  %v255_v12 = vpack.c.bf16 %v84_v9, %v83_v7  ;;  %v232_v26 = vld [vmem:[%s411_s3] ss:$0 sm:$0xff] }
  0x29   :  { %65 = vst.msk [vmem:[#allocation2 + $0x8] sm:$0xff] %vm63_vm0, %v62_v4  ;;  %v67_v11 = vmul.f32 %v62_v4, %v62_v4  ;;  %252 = vmatprep.subr.bf16.mxu0 %v251_v8  ;;  %v233_v36 = vld [vmem:[%s412_s4] ss:$0 sm:$0xff] }
  0x2a   :  { %v68_v13 = vsel %vm63_vm0, %v66_v10, 0.0  ;;  %254 = vmatpush3.bf16.msra.mxu0 %v251_v8 }
  0x2b   :  { %69 = vadd.xlane.f32.xlu0 %v68_v13  ;;  %256 = vmatprep.subr.bf16.mxu0 %v255_v12  ;;  %v71_v14 = vsel %vm63_vm0, %v67_v11, 0.0 }
  0x2e   :  { %258 = vmatpush3.bf16.msra.mxu0 %v255_v12  ;;  %v196_v41 = vld [vmem:[#allocation4] sm:$0xff]  ;;  %v197_v44 = vld [vmem:[#allocation4 + $0x8] sm:$0xff] }
  0x2f   :  { %72 = vadd.xlane.f32.xlu0 %v71_v14  ;;  %v79_v15 = vld [vmem:[#allocation2] sm:$0xff] }
  0x30   :  { %v80_v16 = vld [vmem:[#allocation2 + $0x8] sm:$0xff]  ;;  %248 = vmatprep.mubr.msk.f32.mxu0 %vm63_vm0, %v79_v15 }
  0x31   :  { %249 = vmatmul.mubr.msk.f32.vlgmr.msra.gmra.mrb[0].mxu0 %vm63_vm0, %v80_v16 }
  0xb8   :  { %v70_v18 = vpop.xlane.xlu0 %69 }
  0xb9   :  { %75 = vst.msk [vmem:[#allocation3] sm:$0xff] %vm74_vm1, %v70_v18 }
  0xbc   :  { %v73_v19 = vpop.xlane.xlu0 %72 }
  0xbd   :  { %76 = vst.msk [vmem:[#allocation3 + $0x8] sm:$0xff] %vm74_vm1, %v73_v19 }
  0xc0   :  { %v169_v20 = vld [vmem:[#allocation3] sm:$0xff] }
  0xc1   :  { %173 = vperm.xlu1 %265, %v169_v20  }
  0xc4   :  { %v170_v21 = vld [vmem:[#allocation3 + $0x8] sm:$0xff] }
  0xc5   :  { %178 = vperm.xlu1 %265, %v170_v21  }
 0x104   :  { %v250_v23 = vpop.f32.mrb[0].mxu0 }
 0x105   :  { %v158_v24 = vpop.f32.mrb[1].mxu0  ;;  %v168_v28 = vmul.f32 2.0, %v250_v23 }
 0x106   :  { %v167_v25 = vmul.f32 2.0, %v158_v24 }
 0x140   :  { %v174_v27 = vpop.permute.xlu1 %173 }
 0x141   :  { %v181_v29 = vsub.f32 %v167_v25, %v174_v27 }
 0x143   :  { %v190_v30 = vsub.f32 %v181_v29, %v232_v26 }
 0x144   :  { %v179_v31 = vpop.permute.xlu1 %178 }
 0x145   :  { %v192_v32 = vmul.f32 1.442695, %v190_v30  ;;  %v182_v33 = vsub.f32 %v168_v28, %v179_v31 }
 0x147   :  { %267 = vpow2.f32 %v192_v32  ;;  %v191_v34 = vsub.f32 %v182_v33, %v232_v26 }
 0x149   :  { %v194_v35 = vmul.f32 1.442695, %v191_v34 }
 0x14b   :  { %269 = vpow2.f32 %v194_v35 }
 0x151   :  { %v268_v37 = vpop.eup %267 }
 0x152   :  { %v205_v38 = vmul.f32 %v268_v37, %v233_v36 }
 0x154   :  { %207 = vadd.xlane.f32.xlu0 %v205_v38 }
 0x155   :  { %v270_v39 = vpop.eup %269 }
 0x156   :  { %v206_v40 = vmul.f32 %v270_v39, %v233_v36 }
 0x158   :  { %209 = vadd.xlane.f32.xlu1 %v206_v40 }
 0x1e1   :  { %v208_v42 = vpop.xlane.xlu0 %207 }
 0x1e2   :  { %v211_v43 = vadd.f32 %v208_v42, %v196_v41 }
 0x1e4   :  { %214 = vst.msk [vmem:[#allocation4] sm:$0xff] %vm74_vm1, %v211_v43 }
 0x1e5   :  { %v210_v45 = vpop.xlane.xlu1 %209 }
 0x1e6   :  { %v212_v46 = vadd.f32 %v210_v45, %v197_v44 }
 0x1e8   :  { %215 = vst.msk [vmem:[#allocation4 + $0x8] sm:$0xff] %vm74_vm1, %v212_v46 }
 0x1eb   :  { %v219_v47 = vld [vmem:[#allocation4] sm:$0xff] }
 0x1ec   :  { %221 = vst.msk [vmem:[%s413_s5] sm:$0xff] %vm74_vm1, %v219_v47 }
 0x1ef   :  { %v220_v48 = vld [vmem:[#allocation4 + $0x8] sm:$0xff] }
 0x1f0   :  { %222 = vst.msk [vmem:[%s413_s5 + $0x8] sm:$0xff] %vm74_vm1, %v220_v48 }
 0x1f1   :  { %227 = vsyncpa [#allocation6], 1 }
 0x1f2   :  { %228 = vsyncpa [#allocation8], 1 }

</bundles_post_ra>
